<compile_context>
chip_gen: v7x
topology: tpu7x:2x2x1
jax: 0.10.0
libtpu: 0.0.40
codegen_flags: <defaults>
</compile_context>

<pallas_src>
import math

import jax
import jax.numpy as jnp
from jax.experimental import pallas as pl
from jax.experimental.pallas import tpu as pltpu

# ---------------- model hyperparameters (match the PyTorch __init__) ----------------
STATE_SIZE = 16           # state_size (14 normalized cols + extras)
ACTION_SIZE = 4           # action_size
NUM_ATOMS = 51            # num_atoms
ATOM_PAD = 128            # atoms padded to one full vreg lane-width per action
V_MIN = -10.0
V_MAX = 10.0
HIDDEN = 128
BATCH = 8
NEG_PAD = -1e30           # bias for dummy atoms -> softmax prob exactly 0


def dist_dqn_kernel(x_ref, w1_ref, b1_ref, w2_ref, b2_ref, w3_ref, b3_ref,
                    s_ref, qv_ref, qp_ref):
    """3-layer MLP + per-action softmax (lane-aligned) + expected value via MXU.

    x_ref   : [TB, S]              bf16
    w1..w3  : [in, out]            bf16 (w3 padded to A*128 cols)
    b1..b3  : [1, out]             f32  (b3 padded, dummy lanes = NEG_PAD)
    s_ref   : [A*128, A]           f32  block-diagonal support matrix
    qv_ref  : [TB, A]              f32  expected Q values (batch-major)
    qp_ref  : [TB, A*128]          f32  padded atom probabilities (lane-dense)
    """
    x = x_ref[...]

    # MLP hot path: bf16 operands, f32 accumulation on the MXU.
    h1 = jnp.dot(x, w1_ref[...], preferred_element_type=jnp.float32) + b1_ref[...]
    h1 = jnp.maximum(h1, 0.0)
    h2 = jnp.dot(h1.astype(jnp.bfloat16), w2_ref[...],
                 preferred_element_type=jnp.float32) + b2_ref[...]
    h2 = jnp.maximum(h2, 0.0)
    logits = jnp.dot(h2.astype(jnp.bfloat16), w3_ref[...],
                     preferred_element_type=jnp.float32) + b3_ref[...]   # [TB, A*128]

    # Per-action softmax over a vreg-aligned 128-lane block (A is tiny -> unroll).
    prob_blocks = []
    for a in range(ACTION_SIZE):
        la = logits[:, a * ATOM_PAD:(a + 1) * ATOM_PAD]          # aligned [TB, 128]
        m = jnp.max(la, axis=-1, keepdims=True)
        e = jnp.exp(la - m)                                      # dummy lanes -> 0
        denom = jnp.sum(e, axis=-1, keepdims=True)
        inv = pl.reciprocal(denom, approx=True)                  # EUP slot
        inv = inv * (2.0 - denom * inv)                          # 1 Newton step: ~exact
        prob_blocks.append(e * inv)

    probs = jnp.concatenate(prob_blocks, axis=-1)                # [TB, A*128]
    qp_ref[...] = probs                                          # single lane-dense store
    # Expected value: one MXU dot against the block-diagonal support matrix.
    qv_ref[...] = jnp.dot(probs, s_ref[...], preferred_element_type=jnp.float32)


def dist_dqn_forward(x, kparams):
    """Calls the Pallas kernel; returns (q_values [B,A], q_probs [B,A,N]) like PyTorch."""
    w1, b1, w2, b2, w3p, b3p, s_mat = kparams
    B = x.shape[0]
    TB = B if B <= 128 else 128
    assert B % TB == 0, "pad the batch to a multiple of the batch tile"
    AP = ACTION_SIZE * ATOM_PAD

    qv, qp_pad = pl.pallas_call(
        dist_dqn_kernel,
        out_shape=(
            jax.ShapeDtypeStruct((B, ACTION_SIZE), jnp.float32),
            jax.ShapeDtypeStruct((B, AP), jnp.float32),
        ),
        grid=(B // TB,),
        in_specs=[
            pl.BlockSpec((TB, STATE_SIZE), lambda i: (i, 0)),
            pl.BlockSpec((STATE_SIZE, HIDDEN), lambda i: (0, 0)),
            pl.BlockSpec((1, HIDDEN), lambda i: (0, 0)),
            pl.BlockSpec((HIDDEN, HIDDEN), lambda i: (0, 0)),
            pl.BlockSpec((1, HIDDEN), lambda i: (0, 0)),
            pl.BlockSpec((HIDDEN, AP), lambda i: (0, 0)),
            pl.BlockSpec((1, AP), lambda i: (0, 0)),
            pl.BlockSpec((AP, ACTION_SIZE), lambda i: (0, 0)),
        ],
        out_specs=(
            pl.BlockSpec((TB, ACTION_SIZE), lambda i: (i, 0)),
            pl.BlockSpec((TB, AP), lambda i: (i, 0)),
        ),
        compiler_params=pltpu.CompilerParams(
            dimension_semantics=("parallel",)),   # shards batch tiles over 2 TCs on v7x
    )(x.astype(jnp.bfloat16), w1, b1, w2, b2, w3p, b3p, s_mat)

    # Strip the dummy atoms (cheap slice); layout is already batch-major.
    q_probs = qp_pad.reshape(B, ACTION_SIZE, ATOM_PAD)[:, :, :NUM_ATOMS]
    return qv, q_probs


# ---------------- parameter construction ----------------
def kaiming_uniform(key, fan_in, fan_out):
    """Kaiming-uniform (nonlinearity='relu'), stored [in, out] (transposed vs PyTorch)."""
    bound = math.sqrt(6.0 / fan_in)
    return jax.random.uniform(key, (fan_in, fan_out), jnp.float32, -bound, bound)


def init_params(key):
    k1, k2, k3 = jax.random.split(key, 3)
    w1 = kaiming_uniform(k1, STATE_SIZE, HIDDEN)
    b1 = jnp.zeros((1, HIDDEN), jnp.float32)
    w2 = kaiming_uniform(k2, HIDDEN, HIDDEN)
    b2 = jnp.zeros((1, HIDDEN), jnp.float32)
    w3 = kaiming_uniform(k3, HIDDEN, ACTION_SIZE * NUM_ATOMS)
    b3 = jnp.zeros((1, ACTION_SIZE * NUM_ATOMS), jnp.float32)
    return (w1, b1, w2, b2, w3, b3)


def prepare_kernel_params(params, support):
    """Pad the atom axis to 128 lanes/action, build the block-diag support matrix,
    and cast matmul weights to bf16 (biases stay f32)."""
    w1, b1, w2, b2, w3, b3 = params
    AP = ACTION_SIZE * ATOM_PAD

    w3p = jnp.zeros((HIDDEN, AP), jnp.float32)
    b3p = jnp.full((1, AP), NEG_PAD, jnp.float32)
    s_mat = jnp.zeros((AP, ACTION_SIZE), jnp.float32)
    for a in range(ACTION_SIZE):
        lo, hi = a * ATOM_PAD, a * ATOM_PAD + NUM_ATOMS
        w3p = w3p.at[:, lo:hi].set(w3[:, a * NUM_ATOMS:(a + 1) * NUM_ATOMS])
        b3p = b3p.at[:, lo:hi].set(b3[:, a * NUM_ATOMS:(a + 1) * NUM_ATOMS])
        s_mat = s_mat.at[lo:hi, a].set(support)

    return (w1.astype(jnp.bfloat16), b1,
            w2.astype(jnp.bfloat16), b2,
            w3p.astype(jnp.bfloat16), b3p, s_mat)


def reference_forward(x, params, support):
    """Pure-JAX reference mirroring the PyTorch forward (same bf16-matmul numerics)."""
    w1, b1, w2, b2, w3, b3 = params
    xb = x.astype(jnp.bfloat16)
    h1 = jnp.maximum(jnp.dot(xb, w1.astype(jnp.bfloat16),
                             preferred_element_type=jnp.float32) + b1, 0.0)
    h2 = jnp.maximum(jnp.dot(h1.astype(jnp.bfloat16), w2.astype(jnp.bfloat16),
                             preferred_element_type=jnp.float32) + b2, 0.0)
    q_atoms = (jnp.dot(h2.astype(jnp.bfloat16), w3.astype(jnp.bfloat16),
                       preferred_element_type=jnp.float32) + b3)
    q_atoms = q_atoms.reshape(-1, ACTION_SIZE, NUM_ATOMS)
    q_probs = jax.nn.softmax(q_atoms, axis=2)
    q_values = jnp.sum(q_probs * support.reshape(1, 1, NUM_ATOMS), axis=2)
    return q_values, q_probs


# TODO(synk): replay memory, epsilon-greedy action selection, KL-divergence training
# and the categorical projection are host-side / training logic, not part of forward.

if __name__ == "__main__":
    key = jax.random.PRNGKey(0)
    kp, kx = jax.random.split(key)

    params = init_params(kp)
    support = jnp.linspace(V_MIN, V_MAX, NUM_ATOMS, dtype=jnp.float32)
    kparams = prepare_kernel_params(params, support)

    # Deterministic example input (already "normalized" states in [0, 1]).
    x = jax.random.uniform(kx, (BATCH, STATE_SIZE), jnp.float32)

    q_values, q_probs = jax.jit(dist_dqn_forward)(x, kparams)
    q_values = jax.block_until_ready(q_values)
    q_probs = jax.block_until_ready(q_probs)

    # Validate against a pure-JAX reference of the same forward pass.
    qv_ref, qp_ref = reference_forward(x, params, support)
    assert q_values.shape == (BATCH, ACTION_SIZE)
    assert q_probs.shape == (BATCH, ACTION_SIZE, NUM_ATOMS)
    assert jnp.allclose(q_probs, qp_ref, atol=5e-4, rtol=1e-3)
    assert jnp.allclose(q_values, qv_ref, atol=2e-3, rtol=1e-3)
    assert jnp.allclose(jnp.sum(q_probs, axis=-1), 1.0, atol=5e-4)

    print("KERNEL_OK")
</pallas_src>

<mosaic_0001>
module attributes {stable_mosaic.version = 11 : i64} {
  func.func @dist_dqn_kernel(%arg0: i32, %arg1: memref<8x16xbf16, #tpu.memory_space<vmem>>, %arg2: memref<16x128xbf16, #tpu.memory_space<vmem>>, %arg3: memref<1x128xf32, #tpu.memory_space<vmem>>, %arg4: memref<128x128xbf16, #tpu.memory_space<vmem>>, %arg5: memref<1x128xf32, #tpu.memory_space<vmem>>, %arg6: memref<128x512xbf16, #tpu.memory_space<vmem>>, %arg7: memref<1x512xf32, #tpu.memory_space<vmem>>, %arg8: memref<512x4xf32, #tpu.memory_space<vmem>>, %arg9: memref<8x4xf32, #tpu.memory_space<vmem>>, %arg10: memref<8x512xf32, #tpu.memory_space<vmem>>) attributes {dimension_semantics = [#tpu.dimension_semantics<parallel>], iteration_bounds = array<i64: 1>, scalar_prefetch = 0 : i64, scratch_operands = 0 : i64, tpu.core_type = #tpu.core_type<tc>, window_params = [{transform_indices = @transform_0, window_bounds = array<i64: 8, 16>}, {pipeline_mode = #tpu.pipeline_mode<synchronous>, transform_indices = @transform_1, window_bounds = array<i64: 16, 128>}, {pipeline_mode = #tpu.pipeline_mode<synchronous>, transform_indices = @transform_2, window_bounds = array<i64: 1, 128>}, {pipeline_mode = #tpu.pipeline_mode<synchronous>, transform_indices = @transform_3, window_bounds = array<i64: 128, 128>}, {pipeline_mode = #tpu.pipeline_mode<synchronous>, transform_indices = @transform_4, window_bounds = array<i64: 1, 128>}, {pipeline_mode = #tpu.pipeline_mode<synchronous>, transform_indices = @transform_5, window_bounds = array<i64: 128, 512>}, {pipeline_mode = #tpu.pipeline_mode<synchronous>, transform_indices = @transform_6, window_bounds = array<i64: 1, 512>}, {pipeline_mode = #tpu.pipeline_mode<synchronous>, transform_indices = @transform_7, window_bounds = array<i64: 512, 4>}, {transform_indices = @transform_8, window_bounds = array<i64: 8, 4>}, {transform_indices = @transform_9, window_bounds = array<i64: 8, 512>}]} {
    %c0 = arith.constant 0 : index
    %c0_0 = arith.constant 0 : index
    %0 = vector.load %arg1[%c0, %c0_0] : memref<8x16xbf16, #tpu.memory_space<vmem>>, vector<8x16xbf16>
    %c0_1 = arith.constant 0 : index
    %c0_2 = arith.constant 0 : index
    %1 = vector.load %arg2[%c0_1, %c0_2] : memref<16x128xbf16, #tpu.memory_space<vmem>>, vector<16x128xbf16>
    %cst = arith.constant dense<0.000000e+00> : vector<8x128xf32>
    %2 = tpu.matmul %0, %1, %cst {dimension_numbers = #tpu.dot_dimension_numbers<[1], [0], [0], [1], [0, 0, 1, 1], [], []>} : vector<8x16xbf16>, vector<16x128xbf16>, vector<8x128xf32> -> vector<8x128xf32>
    %c0_3 = arith.constant 0 : index
    %c0_4 = arith.constant 0 : index
    %3 = vector.load %arg3[%c0_3, %c0_4] : memref<1x128xf32, #tpu.memory_space<vmem>>, vector<1x128xf32>
    %4 = vector.broadcast %3 : vector<1x128xf32> to vector<8x128xf32>
    %5 = arith.addf %2, %4 : vector<8x128xf32>
    %cst_5 = arith.constant 0.000000e+00 : f32
    %6 = vector.broadcast %cst_5 : f32 to vector<8x128xf32>
    %7 = arith.maximumf %5, %6 : vector<8x128xf32>
    %8 = arith.truncf %7 : vector<8x128xf32> to vector<8x128xbf16>
    %c0_6 = arith.constant 0 : index
    %c0_7 = arith.constant 0 : index
    %9 = vector.load %arg4[%c0_6, %c0_7] : memref<128x128xbf16, #tpu.memory_space<vmem>>, vector<128x128xbf16>
    %cst_8 = arith.constant dense<0.000000e+00> : vector<8x128xf32>
    %10 = tpu.matmul %8, %9, %cst_8 {dimension_numbers = #tpu.dot_dimension_numbers<[1], [0], [0], [1], [0, 0, 1, 1], [], []>} : vector<8x128xbf16>, vector<128x128xbf16>, vector<8x128xf32> -> vector<8x128xf32>
    %c0_9 = arith.constant 0 : index
    %c0_10 = arith.constant 0 : index
    %11 = vector.load %arg5[%c0_9, %c0_10] : memref<1x128xf32, #tpu.memory_space<vmem>>, vector<1x128xf32>
    %12 = vector.broadcast %11 : vector<1x128xf32> to vector<8x128xf32>
    %13 = arith.addf %10, %12 : vector<8x128xf32>
    %cst_11 = arith.constant 0.000000e+00 : f32
    %14 = vector.broadcast %cst_11 : f32 to vector<8x128xf32>
    %15 = arith.maximumf %13, %14 : vector<8x128xf32>
    %16 = arith.truncf %15 : vector<8x128xf32> to vector<8x128xbf16>
    %c0_12 = arith.constant 0 : index
    %c0_13 = arith.constant 0 : index
    %17 = vector.load %arg6[%c0_12, %c0_13] : memref<128x512xbf16, #tpu.memory_space<vmem>>, vector<128x512xbf16>
    %cst_14 = arith.constant dense<0.000000e+00> : vector<8x512xf32>
    %18 = tpu.matmul %16, %17, %cst_14 {dimension_numbers = #tpu.dot_dimension_numbers<[1], [0], [0], [1], [0, 0, 1, 1], [], []>} : vector<8x128xbf16>, vector<128x512xbf16>, vector<8x512xf32> -> vector<8x512xf32>
    %c0_15 = arith.constant 0 : index
    %c0_16 = arith.constant 0 : index
    %19 = vector.load %arg7[%c0_15, %c0_16] : memref<1x512xf32, #tpu.memory_space<vmem>>, vector<1x512xf32>
    %20 = vector.broadcast %19 : vector<1x512xf32> to vector<8x512xf32>
    %21 = arith.addf %18, %20 : vector<8x512xf32>
    %22 = vector.extract_strided_slice %21 {offsets = [0, 0], sizes = [8, 128], strides = [1, 1]} : vector<8x512xf32> to vector<8x128xf32>
    %cst_17 = arith.constant dense<0xFF800000> : vector<8xf32>
    %23 = vector.multi_reduction <maximumf>, %22, %cst_17 [1] : vector<8x128xf32> to vector<8xf32>
    %24 = vector.shape_cast %23 : vector<8xf32> to vector<8x1xf32>
    %25 = vector.broadcast %24 : vector<8x1xf32> to vector<8x128xf32>
    %26 = arith.subf %22, %25 : vector<8x128xf32>
    %27 = math.exp %26 : vector<8x128xf32>
    %cst_18 = arith.constant dense<0.000000e+00> : vector<8xf32>
    %28 = vector.multi_reduction <add>, %27, %cst_18 [1] : vector<8x128xf32> to vector<8xf32>
    %29 = vector.shape_cast %28 : vector<8xf32> to vector<8x1xf32>
    %30 = tpu.reciprocal %29 {approx = true} : vector<8x1xf32> -> vector<8x1xf32>
    %31 = arith.mulf %29, %30 : vector<8x1xf32>
    %cst_19 = arith.constant 2.000000e+00 : f32
    %32 = vector.broadcast %cst_19 : f32 to vector<8x1xf32>
    %33 = arith.subf %32, %31 : vector<8x1xf32>
    %34 = arith.mulf %30, %33 : vector<8x1xf32>
    %35 = vector.broadcast %34 : vector<8x1xf32> to vector<8x128xf32>
    %36 = arith.mulf %27, %35 : vector<8x128xf32>
    %37 = vector.extract_strided_slice %21 {offsets = [0, 128], sizes = [8, 128], strides = [1, 1]} : vector<8x512xf32> to vector<8x128xf32>
    %cst_20 = arith.constant dense<0xFF800000> : vector<8xf32>
    %38 = vector.multi_reduction <maximumf>, %37, %cst_20 [1] : vector<8x128xf32> to vector<8xf32>
    %39 = vector.shape_cast %38 : vector<8xf32> to vector<8x1xf32>
    %40 = vector.broadcast %39 : vector<8x1xf32> to vector<8x128xf32>
    %41 = arith.subf %37, %40 : vector<8x128xf32>
    %42 = math.exp %41 : vector<8x128xf32>
    %cst_21 = arith.constant dense<0.000000e+00> : vector<8xf32>
    %43 = vector.multi_reduction <add>, %42, %cst_21 [1] : vector<8x128xf32> to vector<8xf32>
    %44 = vector.shape_cast %43 : vector<8xf32> to vector<8x1xf32>
    %45 = tpu.reciprocal %44 {approx = true} : vector<8x1xf32> -> vector<8x1xf32>
    %46 = arith.mulf %44, %45 : vector<8x1xf32>
    %cst_22 = arith.constant 2.000000e+00 : f32
    %47 = vector.broadcast %cst_22 : f32 to vector<8x1xf32>
    %48 = arith.subf %47, %46 : vector<8x1xf32>
    %49 = arith.mulf %45, %48 : vector<8x1xf32>
    %50 = vector.broadcast %49 : vector<8x1xf32> to vector<8x128xf32>
    %51 = arith.mulf %42, %50 : vector<8x128xf32>
    %52 = vector.extract_strided_slice %21 {offsets = [0, 256], sizes = [8, 128], strides = [1, 1]} : vector<8x512xf32> to vector<8x128xf32>
    %cst_23 = arith.constant dense<0xFF800000> : vector<8xf32>
    %53 = vector.multi_reduction <maximumf>, %52, %cst_23 [1] : vector<8x128xf32> to vector<8xf32>
    %54 = vector.shape_cast %53 : vector<8xf32> to vector<8x1xf32>
    %55 = vector.broadcast %54 : vector<8x1xf32> to vector<8x128xf32>
    %56 = arith.subf %52, %55 : vector<8x128xf32>
    %57 = math.exp %56 : vector<8x128xf32>
    %cst_24 = arith.constant dense<0.000000e+00> : vector<8xf32>
    %58 = vector.multi_reduction <add>, %57, %cst_24 [1] : vector<8x128xf32> to vector<8xf32>
    %59 = vector.shape_cast %58 : vector<8xf32> to vector<8x1xf32>
    %60 = tpu.reciprocal %59 {approx = true} : vector<8x1xf32> -> vector<8x1xf32>
    %61 = arith.mulf %59, %60 : vector<8x1xf32>
    %cst_25 = arith.constant 2.000000e+00 : f32
    %62 = vector.broadcast %cst_25 : f32 to vector<8x1xf32>
    %63 = arith.subf %62, %61 : vector<8x1xf32>
    %64 = arith.mulf %60, %63 : vector<8x1xf32>
    %65 = vector.broadcast %64 : vector<8x1xf32> to vector<8x128xf32>
    %66 = arith.mulf %57, %65 : vector<8x128xf32>
    %67 = vector.extract_strided_slice %21 {offsets = [0, 384], sizes = [8, 128], strides = [1, 1]} : vector<8x512xf32> to vector<8x128xf32>
    %cst_26 = arith.constant dense<0xFF800000> : vector<8xf32>
    %68 = vector.multi_reduction <maximumf>, %67, %cst_26 [1] : vector<8x128xf32> to vector<8xf32>
    %69 = vector.shape_cast %68 : vector<8xf32> to vector<8x1xf32>
    %70 = vector.broadcast %69 : vector<8x1xf32> to vector<8x128xf32>
    %71 = arith.subf %67, %70 : vector<8x128xf32>
    %72 = math.exp %71 : vector<8x128xf32>
    %cst_27 = arith.constant dense<0.000000e+00> : vector<8xf32>
    %73 = vector.multi_reduction <add>, %72, %cst_27 [1] : vector<8x128xf32> to vector<8xf32>
    %74 = vector.shape_cast %73 : vector<8xf32> to vector<8x1xf32>
    %75 = tpu.reciprocal %74 {approx = true} : vector<8x1xf32> -> vector<8x1xf32>
    %76 = arith.mulf %74, %75 : vector<8x1xf32>
    %cst_28 = arith.constant 2.000000e+00 : f32
    %77 = vector.broadcast %cst_28 : f32 to vector<8x1xf32>
    %78 = arith.subf %77, %76 : vector<8x1xf32>
    %79 = arith.mulf %75, %78 : vector<8x1xf32>
    %80 = vector.broadcast %79 : vector<8x1xf32> to vector<8x128xf32>
    %81 = arith.mulf %72, %80 : vector<8x128xf32>
    %82 = tpu.concatenate %36, %51, %66, %81 in 1 : vector<8x128xf32>, vector<8x128xf32>, vector<8x128xf32>, vector<8x128xf32> -> vector<8x512xf32>
    %c0_29 = arith.constant 0 : index
    %c0_30 = arith.constant 0 : index
    %83 = vector.load %arg10[%c0_29, %c0_30] : memref<8x512xf32, #tpu.memory_space<vmem>>, vector<8x512xf32>
    tpu.vector_store %arg10[%c0_29, %c0_30], %82 {strides = array<i32>} : memref<8x512xf32, #tpu.memory_space<vmem>>, vector<8x512xf32>,
    %c0_31 = arith.constant 0 : index
    %c0_32 = arith.constant 0 : index
    %84 = vector.load %arg8[%c0_31, %c0_32] : memref<512x4xf32, #tpu.memory_space<vmem>>, vector<512x4xf32>
    %cst_33 = arith.constant dense<0.000000e+00> : vector<8x4xf32>
    %85 = tpu.matmul %82, %84, %cst_33 {dimension_numbers = #tpu.dot_dimension_numbers<[1], [0], [0], [1], [0, 0, 1, 1], [], []>} : vector<8x512xf32>, vector<512x4xf32>, vector<8x4xf32> -> vector<8x4xf32>
    %c0_34 = arith.constant 0 : index
    %c0_35 = arith.constant 0 : index
    %86 = vector.load %arg9[%c0_34, %c0_35] : memref<8x4xf32, #tpu.memory_space<vmem>>, vector<8x4xf32>
    tpu.vector_store %arg9[%c0_34, %c0_35], %85 {strides = array<i32>} : memref<8x4xf32, #tpu.memory_space<vmem>>, vector<8x4xf32>,
    return
  }
  func.func @transform_0(%arg0: i32) -> (i32, i32) {
    %c0_i32 = arith.constant 0 : i32
    %c0_i32_0 = arith.constant 0 : i32
    return %arg0, %c0_i32 : i32, i32
  }
  func.func @transform_1(%arg0: i32) -> (i32, i32) {
    %c0_i32 = arith.constant 0 : i32
    %c0_i32_0 = arith.constant 0 : i32
    %c0_i32_1 = arith.constant 0 : i32
    return %c0_i32, %c0_i32_0 : i32, i32
  }
  func.func @transform_2(%arg0: i32) -> (i32, i32) {
    %c0_i32 = arith.constant 0 : i32
    %c0_i32_0 = arith.constant 0 : i32
    %c0_i32_1 = arith.constant 0 : i32
    return %c0_i32, %c0_i32_0 : i32, i32
  }
  func.func @transform_3(%arg0: i32) -> (i32, i32) {
    %c0_i32 = arith.constant 0 : i32
    %c0_i32_0 = arith.constant 0 : i32
    %c0_i32_1 = arith.constant 0 : i32
    return %c0_i32, %c0_i32_0 : i32, i32
  }
  func.func @transform_4(%arg0: i32) -> (i32, i32) {
    %c0_i32 = arith.constant 0 : i32
    %c0_i32_0 = arith.constant 0 : i32
    %c0_i32_1 = arith.constant 0 : i32
    return %c0_i32, %c0_i32_0 : i32, i32
  }
  func.func @transform_5(%arg0: i32) -> (i32, i32) {
    %c0_i32 = arith.constant 0 : i32
    %c0_i32_0 = arith.constant 0 : i32
    %c0_i32_1 = arith.constant 0 : i32
    return %c0_i32, %c0_i32_0 : i32, i32
  }
  func.func @transform_6(%arg0: i32) -> (i32, i32) {
    %c0_i32 = arith.constant 0 : i32
    %c0_i32_0 = arith.constant 0 : i32
    %c0_i32_1 = arith.constant 0 : i32
    return %c0_i32, %c0_i32_0 : i32, i32
  }
  func.func @transform_7(%arg0: i32) -> (i32, i32) {
    %c0_i32 = arith.constant 0 : i32
    %c0_i32_0 = arith.constant 0 : i32
    %c0_i32_1 = arith.constant 0 : i32
    return %c0_i32, %c0_i32_0 : i32, i32
  }
  func.func @transform_8(%arg0: i32) -> (i32, i32) {
    %c0_i32 = arith.constant 0 : i32
    %c0_i32_0 = arith.constant 0 : i32
    return %arg0, %c0_i32 : i32, i32
  }
  func.func @transform_9(%arg0: i32) -> (i32, i32) {
    %c0_i32 = arith.constant 0 : i32
    %c0_i32_0 = arith.constant 0 : i32
    return %arg0, %c0_i32 : i32, i32
  }
}

</mosaic_0001>

<bundles_post_ra>
// kernel: dist_dqn_forward.1
= control target key start
LH: loop header
LB: loop body
LE: loop exit
PB: predicated region body
PF: predicated region fallthrough
CT: control target
= control target key end

     0   :  { %v1060_v0 = vmov 0.0   ;;  %vm1061_vm0 = vmmov 0   ;;  %vm48_vm1 = vcmask 130048   ;;  %v1062_v51 = vmov 0   ;;  %s1471_s1 = inlined_call_operand.vmem [shape: bf16[16,128], index: 1, kind: input, shape index: {}]   ;;  %s1472_s0 = inlined_call_operand.vmem [shape: bf16[8,16], index: 0, kind: input, shape index: {}]   ;;  %s1473_s3 = inlined_call_operand.vmem [shape: bf16[128,128], index: 3, kind: input, shape index: {}]   ;;  %s1474_s5 = inlined_call_operand.vmem [shape: bf16[128,512], index: 5, kind: input, shape index: {}]   ;;  %s1475_s2 = inlined_call_operand.vmem [shape: f32[1,128], index: 2, kind: input, shape index: {}]   ;;  %s1476_s4 = inlined_call_operand.vmem [shape: f32[1,128], index: 4, kind: input, shape index: {}]   ;;  %s1477_s6 = inlined_call_operand.vmem [shape: f32[1,512], index: 6, kind: input, shape index: {}]   ;;  %s1478_s7 = inlined_call_operand.vmem [shape: f32[512,4], index: 7, kind: input, shape index: {}]   ;;  %s1479_s9 = inlined_call_operand.vmem [shape: f32[8,512], index: 9, kind: output, shape index: {1}]   ;;  %s1480_s8 = inlined_call_operand.vmem [shape: f32[8,4], index: 8, kind: output, shape index: {0}]  }
   0x1   :  { %894 = vmatprep.subr.bf16.mxu0 %v1060_v0  ;;  %v987_v1 = vld [vmem:[%s1471_s1] sm:$0xff]   ;;  %896 = vmatprep.mubr.msk.bf16.mxu0 %vm1061_vm0, %v1060_v0  ;;  %v989_v4 = vld [vmem:[%s1473_s3 + $0x8] sm:$0xff]   ;;  %v990_v5 = vld [vmem:[%s1473_s3 + $0x10] sm:$0xff]   ;;  %v241_v60 = vlaneseq  ;;  %vm759_vm2 = vcmask 31744  }
   0x2   :  { %v32_v2 = vld [vmem:[%s1472_s0] sm:$0xf]  ;;  %900 = vmatprep.subr.bf16.mxu1 %v1060_v0  ;;  %916 = vmatprep.mubr.msk.bf16.mxu1 %vm1061_vm0, %v1060_v0  ;;  %v991_v6 = vld [vmem:[%s1473_s3 + $0x18] sm:$0xff]   ;;  %v993_v8 = vld [vmem:[%s1473_s3 + $0x28] sm:$0xff]  }
   0x3   :  { %895 = vmatpush3.bf16.msra.mxu0 %v987_v1  ;;  %v988_v3 = vld [vmem:[%s1473_s3] sm:$0xff]   ;;  %v994_v9 = vld [vmem:[%s1473_s3 + $0x30] sm:$0xff]   ;;  %v995_v10 = vld [vmem:[%s1473_s3 + $0x38] sm:$0xff]   ;;  %v242_v61 = vshrl.u32 %v241_v60, 7 }
   0x4   :  { %901 = vmatpush3.bf16.msra.mxu1 %v988_v3  ;;  %v992_v7 = vld [vmem:[%s1473_s3 + $0x20] sm:$0xff]   ;;  %v1001_v13 = vld [vmem:[%s1474_s5 + $0xc] ss:$16 sps:$4 sm:$0xff]   ;;  %v999_v33 = vld [vmem:[%s1474_s5 + $0x8] ss:$16 sps:$4 sm:$0xff]  }
   0x5   :  { %902 = vmatprep.subr.bf16.mxu1 %v1060_v0  ;;  %v996_v11 = vld [vmem:[%s1474_s5] ss:$16 sps:$4 sm:$0xff]   ;;  %v998_v12 = vld [vmem:[%s1474_s5 + $0x4] ss:$16 sps:$4 sm:$0xff]   ;;  %v1007_v35 = vld [vmem:[%s1474_s5 + $0x2c] ss:$16 sps:$4 sm:$0xff]  }
   0x6   :  { %897 = vmatmul.mubr.msk.bf16.vlgmr.msra.gmra.mrb[0].mxu0 %vm48_vm1, %v32_v2  ;;  %421 = vmatprep.subr.bf16.mxu0 %v998_v12  ;;  %v1004_v14 = vld [vmem:[%s1474_s5 + $0x24] ss:$16 sps:$4 sm:$0xff]   ;;  %v1002_v15 = vld [vmem:[%s1474_s5 + $0x20] ss:$16 sps:$4 sm:$0xff]   ;;  %v1005_v36 = vld [vmem:[%s1474_s5 + $0x28] ss:$16 sps:$4 sm:$0xff]  }
   0x7   :  { %422 = vmatpush1.bf16.msra.mxu0 %v996_v11  ;;  %v1010_v16 = vld [vmem:[%s1474_s5 + $0x44] ss:$16 sps:$4 sm:$0xff]   ;;  %v1008_v17 = vld [vmem:[%s1474_s5 + $0x40] ss:$16 sps:$4 sm:$0xff]   ;;  %v1013_v37 = vld [vmem:[%s1474_s5 + $0x4c] ss:$16 sps:$4 sm:$0xff]   ;;  %453 = vmatprep.mubr.bf16.mxu0 %v1062_v51 }
   0x8   :  { %903 = vmatpush3.bf16.msra.mxu1 %v989_v4  ;;  %423 = vmatprep.subr.bf16.mxu0 %v1004_v14  ;;  %v1016_v18 = vld [vmem:[%s1474_s5 + $0x64] ss:$16 sps:$4 sm:$0xff]   ;;  %v1014_v19 = vld [vmem:[%s1474_s5 + $0x60] ss:$16 sps:$4 sm:$0xff]   ;;  %v1011_v38 = vld [vmem:[%s1474_s5 + $0x48] ss:$16 sps:$4 sm:$0xff]  }
   0x9   :  { %904 = vmatprep.subr.bf16.mxu1 %v1060_v0  ;;  %v1022_v20 = vld [vmem:[%s1474_s5 + $0x84] ss:$16 sps:$4 sm:$0xff]   ;;  %v1020_v21 = vld [vmem:[%s1474_s5 + $0x80] ss:$16 sps:$4 sm:$0xff]   ;;  %v1019_v39 = vld [vmem:[%s1474_s5 + $0x6c] ss:$16 sps:$4 sm:$0xff]  }
   0xa   :  { %v1028_v22 = vld [vmem:[%s1474_s5 + $0xa4] ss:$16 sps:$4 sm:$0xff]   ;;  %v1026_v23 = vld [vmem:[%s1474_s5 + $0xa0] ss:$16 sps:$4 sm:$0xff]   ;;  %v1017_v40 = vld [vmem:[%s1474_s5 + $0x68] ss:$16 sps:$4 sm:$0xff]  }
   0xb   :  { %424 = vmatpush1.bf16.msra.mxu0 %v1002_v15  ;;  %v1034_v24 = vld [vmem:[%s1474_s5 + $0xc4] ss:$16 sps:$4 sm:$0xff]   ;;  %v1032_v25 = vld [vmem:[%s1474_s5 + $0xc0] ss:$16 sps:$4 sm:$0xff]   ;;  %v1025_v41 = vld [vmem:[%s1474_s5 + $0x8c] ss:$16 sps:$4 sm:$0xff]  }
   0xc   :  { %905 = vmatpush3.bf16.msra.mxu1 %v990_v5  ;;  %425 = vmatprep.subr.bf16.mxu0 %v1010_v16  ;;  %v769_v26 = vld [vmem:[%s1475_s2] ss:$0 sm:$0xff]  ;;  %v1023_v42 = vld [vmem:[%s1474_s5 + $0x88] ss:$16 sps:$4 sm:$0xff]   ;;  %v1031_v43 = vld [vmem:[%s1474_s5 + $0xac] ss:$16 sps:$4 sm:$0xff]  }
   0xd   :  { %906 = vmatprep.subr.bf16.mxu1 %v1060_v0  ;;  %v1029_v44 = vld [vmem:[%s1474_s5 + $0xa8] ss:$16 sps:$4 sm:$0xff]   ;;  %v1037_v45 = vld [vmem:[%s1474_s5 + $0xcc] ss:$16 sps:$4 sm:$0xff]   ;;  %v1040_v47 = vld [vmem:[%s1474_s5 + $0xe4] ss:$16 sps:$4 sm:$0xff]  }
   0xe   :  { %v1035_v46 = vld [vmem:[%s1474_s5 + $0xc8] ss:$16 sps:$4 sm:$0xff]   ;;  %v1043_v48 = vld [vmem:[%s1474_s5 + $0xec] ss:$16 sps:$4 sm:$0xff]   ;;  %v1038_v49 = vld [vmem:[%s1474_s5 + $0xe0] ss:$16 sps:$4 sm:$0xff]  }
   0xf   :  { %426 = vmatpush1.bf16.msra.mxu0 %v1008_v17  ;;  %v1041_v50 = vld [vmem:[%s1474_s5 + $0xe8] ss:$16 sps:$4 sm:$0xff]   ;;  %v772_v52 = vld [vmem:[%s1476_s4] ss:$0 sm:$0xff]  ;;  %v243_v62 = vsub.s32 0, %v242_v61  ;;  %v251_v2 = vsub.s32 2, %v242_v61 }
  0x10   :  { %907 = vmatpush3.bf16.msra.mxu1 %v991_v6  ;;  %427 = vmatprep.subr.bf16.mxu0 %v1016_v18  ;;  %v239_v63 = vld [vmem:[%s1477_s6] sm:$0xf]  ;;  %v255_v4 = vsub.s32 3, %v242_v61  ;;  %v560_v60 = vld [vmem:[%s1478_s7 + $0x28] sm:$0xff] }
  0x11   :  { %908 = vmatprep.subr.bf16.mxu1 %v1060_v0  ;;  %v244_v1 = vrot.slane %v239_v63, %v243_v62 }
  0x12   :  { %v256_v12 = vrot.slane %v239_v63, %v255_v4 }
  0x13   :  { %428 = vmatpush1.bf16.msra.mxu0 %v1014_v19  ;;  %v571_v19 = vld [vmem:[%s1478_s7 + $0x80] sm:$0xff] }
  0x14   :  { %909 = vmatpush3.bf16.msra.mxu1 %v992_v7  ;;  %429 = vmatprep.subr.bf16.mxu0 %v1022_v20  ;;  %v572_v20 = vld [vmem:[%s1478_s7 + $0x88] sm:$0xff] }
  0x15   :  { %910 = vmatprep.subr.bf16.mxu1 %v1060_v0 }
  0x17   :  { %430 = vmatpush1.bf16.msra.mxu0 %v1020_v21  ;;  %v555_v21 = vld [vmem:[%s1478_s7] sm:$0xff] }
  0x18   :  { %911 = vmatpush3.bf16.msra.mxu1 %v993_v8  ;;  %431 = vmatprep.subr.bf16.mxu0 %v1028_v22  ;;  %v252_v8 = vrot.slane %v239_v63, %v251_v2  ;;  %v920_v22 = vpack.c.bf16 %v572_v20, %v571_v19  ;;  %v578_v2 = vld [vmem:[%s1478_s7 + $0xb8] sm:$0xff]  ;;  %v564_v19 = vld [vmem:[%s1478_s7 + $0x48] sm:$0xff] }
  0x19   :  { %912 = vmatprep.subr.bf16.mxu1 %v1060_v0 }
  0x1b   :  { %432 = vmatpush1.bf16.msra.mxu0 %v1026_v23  ;;  %v556_v23 = vld [vmem:[%s1478_s7 + $0x8] sm:$0xff] }
  0x1c   :  { %913 = vmatpush3.bf16.msra.mxu1 %v994_v9  ;;  %433 = vmatprep.subr.bf16.mxu0 %v1034_v24  ;;  %v573_v24 = vld [vmem:[%s1478_s7 + $0x90] sm:$0xff] }
  0x1d   :  { %914 = vmatprep.subr.bf16.mxu1 %v1060_v0  ;;  %v247_v0 = vsub.s32 1, %v242_v61  ;;  %v589_v61 = vld [vmem:[%s1478_s7 + $0x110] sm:$0xff] }
  0x1f   :  { %434 = vmatpush1.bf16.msra.mxu0 %v1032_v25  ;;  %v248_v3 = vrot.slane %v239_v63, %v247_v0  ;;  %v574_v25 = vld [vmem:[%s1478_s7 + $0x98] sm:$0xff] }
  0x20   :  { %915 = vmatpush3.bf16.msra.mxu1 %v995_v10  ;;  %435 = vmatprep.subr.bf16.mxu0 %v1040_v47  ;;  %v590_v63 = vld [vmem:[%s1478_s7 + $0x118] sm:$0xff] }
  0x21   :  { %462 = vmatprep.subr.bf16.mxu1 %v1001_v13  ;;  %v958_v0 = vpack.c.bf16 %v590_v63, %v589_v61  ;;  %v600_v63 = vld [vmem:[%s1478_s7 + $0x168] sm:$0xff] }
  0x23   :  { %436 = vmatpush1.bf16.msra.mxu0 %v1038_v49 }
  0x24   :  { %921 = vmatprep.subr.bf16.mxu0 %v920_v22  ;;  %v593_v22 = vld [vmem:[%s1478_s7 + $0x130] sm:$0xff] }
  0xd9   :  { %v86_v27 = vpop.f32.mrb[0].mxu0 }
  0xda   :  { %v87_v28 = vadd.f32 %v769_v26, %v86_v27  ;;  %v898_v29 = vpop.f32.mrb[1].mxu0  ;;  %v922_v26 = vpack.c.bf16 %v556_v23, %v555_v21  ;;  %v924_v27 = vpack.c.bf16 %v574_v25, %v573_v24  ;;  %v594_v23 = vld [vmem:[%s1478_s7 + $0x138] sm:$0xff]  ;;  %v581_v25 = vld [vmem:[%s1478_s7 + $0xd0] sm:$0xff] }
  0xdb   :  { %v89_v30 = vpop.f32.mrb[2].mxu0  ;;  %v604_v29 = vld [vmem:[%s1478_s7 + $0x188] sm:$0xff]  ;;  %v966_v24 = vpack.c.bf16 %v594_v23, %v593_v22 }
  0xdc   :  { %v92_v31 = vmax.f32 %v87_v28, 0.0  ;;  %v899_v32 = vpop.f32.mrb[3].mxu0  ;;  %v603_v28 = vld [vmem:[%s1478_s7 + $0x180] sm:$0xff]  ;;  %v557_v30 = vld [vmem:[%s1478_s7 + $0x10] sm:$0xff] }
  0xdd   :  { %v558_v32 = vld [vmem:[%s1478_s7 + $0x18] sm:$0xff] }
  0xde   :  { %v93_v34 = vpack.c.bf16 %v92_v31, %v92_v31  ;;  %v952_v31 = vpack.c.bf16 %v604_v29, %v603_v28  ;;  %v612_v29 = vld [vmem:[%s1478_s7 + $0x1c8] sm:$0xff] }
  0xe0   :  { %917 = vmatmul.mubr.bf16.vlgmr.msra.gmra.mrb[0].mxu1 %v93_v34  ;;  %v588_v34 = vld [vmem:[%s1478_s7 + $0x108] sm:$0xff] }
  0xe1   :  { %463 = vmatpush1.bf16.msra.mxu1 %v999_v33  ;;  %494 = vmatprep.mubr.bf16.mxu1 %v1062_v51  ;;  %v587_v33 = vld [vmem:[%s1478_s7 + $0x100] sm:$0xff] }
  0xe2   :  { %464 = vmatprep.subr.bf16.mxu1 %v1007_v35  ;;  %v926_v35 = vpack.c.bf16 %v558_v32, %v557_v30  ;;  %v565_v30 = vld [vmem:[%s1478_s7 + $0x50] sm:$0xff] }
  0xe5   :  { %465 = vmatpush1.bf16.msra.mxu1 %v1005_v36  ;;  %v954_v36 = vpack.c.bf16 %v588_v34, %v587_v33  ;;  %v595_v34 = vld [vmem:[%s1478_s7 + $0x140] sm:$0xff] }
  0xe6   :  { %466 = vmatprep.subr.bf16.mxu1 %v1013_v37  ;;  %v575_v37 = vld [vmem:[%s1478_s7 + $0xa0] sm:$0xff] }
  0xe9   :  { %467 = vmatpush1.bf16.msra.mxu1 %v1011_v38  ;;  %v576_v38 = vld [vmem:[%s1478_s7 + $0xa8] sm:$0xff] }
  0xea   :  { %468 = vmatprep.subr.bf16.mxu1 %v1019_v39  ;;  %v605_v39 = vld [vmem:[%s1478_s7 + $0x190] sm:$0xff] }
  0xed   :  { %469 = vmatpush1.bf16.msra.mxu1 %v1017_v40  ;;  %v928_v40 = vpack.c.bf16 %v576_v38, %v575_v37  ;;  %v583_v37 = vld [vmem:[%s1478_s7 + $0xe0] sm:$0xff]  ;;  %v584_v38 = vld [vmem:[%s1478_s7 + $0xe8] sm:$0xff] }
  0xee   :  { %470 = vmatprep.subr.bf16.mxu1 %v1025_v41  ;;  %v606_v41 = vld [vmem:[%s1478_s7 + $0x198] sm:$0xff] }
  0xf1   :  { %471 = vmatpush1.bf16.msra.mxu1 %v1023_v42  ;;  %v956_v42 = vpack.c.bf16 %v606_v41, %v605_v39  ;;  %v613_v39 = vld [vmem:[%s1478_s7 + $0x1d0] sm:$0xff]  ;;  %v614_v41 = vld [vmem:[%s1478_s7 + $0x1d8] sm:$0xff] }
  0xf2   :  { %472 = vmatprep.subr.bf16.mxu1 %v1031_v43 }
  0xf5   :  { %473 = vmatpush1.bf16.msra.mxu1 %v1029_v44 }
  0xf6   :  { %474 = vmatprep.subr.bf16.mxu1 %v1037_v45 }
  0xf9   :  { %475 = vmatpush1.bf16.msra.mxu1 %v1035_v46 }
  0xfa   :  { %476 = vmatprep.subr.bf16.mxu1 %v1043_v48 }
  0xfd   :  { %477 = vmatpush1.bf16.msra.mxu1 %v1041_v50 }
  0xfe   :  { %953 = vmatprep.subr.bf16.mxu1 %v952_v31  ;;  %v566_v31 = vld [vmem:[%s1478_s7 + $0x58] sm:$0xff] }
  0xff   :  { %v942_v33 = vpack.c.bf16 %v566_v31, %v565_v30 }
 0x1b3   :  { %v199_v53 = vpop.f32.mrb[0].mxu1 }
 0x1b4   :  { %v200_v54 = vadd.f32 %v772_v52, %v199_v53  ;;  %v918_v55 = vpop.f32.mrb[1].mxu1 }
 0x1b5   :  { %v202_v56 = vpop.f32.mrb[2].mxu1 }
 0x1b6   :  { %v205_v57 = vmax.f32 %v200_v54, 0.0  ;;  %v919_v58 = vpop.f32.mrb[3].mxu1 }
 0x1b8   :  { %v206_v59 = vpack.c.bf16 %v205_v57, %v205_v57 }
 0x1ba   :  { %454 = vmatmul.mubr.bf16.vlgmr.msra.gmra.mrb[4].mxu0 %v206_v59  ;;  %495 = vmatmul.mubr.bf16.vlgmr.msra.gmra.mrb[4].mxu1 %v206_v59  ;;  %v559_v59 = vld [vmem:[%s1478_s7 + $0x20] sm:$0xff] }
 0x1bb   :  { %923 = vmatpush3.bf16.msra.mxu0 %v922_v26  ;;  %955 = vmatpush3.bf16.msra.mxu1 %v954_v36  ;;  %v930_v62 = vpack.c.bf16 %v560_v60, %v559_v59  ;;  %v582_v26 = vld [vmem:[%s1478_s7 + $0xd8] sm:$0xff] }
 0x1bc   :  { %925 = vmatprep.subr.bf16.mxu0 %v924_v27  ;;  %957 = vmatprep.subr.bf16.mxu1 %v956_v42  ;;  %v611_v27 = vld [vmem:[%s1478_s7 + $0x1c0] sm:$0xff]  ;;  %v940_v28 = vpack.c.bf16 %v582_v26, %v581_v25  ;;  %v570_v59 = vld [vmem:[%s1478_s7 + $0x78] sm:$0xff] }
 0x1bd   :  { %v968_v32 = vpack.c.bf16 %v612_v29, %v611_v27  ;;  %v567_v42 = vld [vmem:[%s1478_s7 + $0x60] sm:$0xff] }
 0x1bf   :  { %927 = vmatpush3.bf16.msra.mxu0 %v926_v35  ;;  %959 = vmatpush3.bf16.msra.mxu1 %v958_v0  ;;  %v596_v35 = vld [vmem:[%s1478_s7 + $0x148] sm:$0xff] }
 0x1c0   :  { %929 = vmatprep.subr.bf16.mxu0 %v928_v40  ;;  %v970_v36 = vpack.c.bf16 %v596_v35, %v595_v34  ;;  %v944_v40 = vpack.c.bf16 %v584_v38, %v583_v37 }
 0x1c3   :  { %931 = vmatpush3.bf16.msra.mxu0 %v930_v62  ;;  %v599_v62 = vld [vmem:[%s1478_s7 + $0x160] sm:$0xff] }
 0x1c4   :  { %v978_v0 = vpack.c.bf16 %v600_v63, %v599_v62 }
 0x28d   :  { %v455_v5 = vpop.f32.mrb[4].mxu0  ;;  %v496_v6 = vpop.f32.mrb[4].mxu1 }
 0x28e   :  { %v456_v7 = vadd.f32 %v455_v5, %v244_v1  ;;  %v457_v9 = vpop.f32.mrb[5].mxu0  ;;  %v498_v10 = vpop.f32.mrb[5].mxu1  ;;  %v497_v17 = vadd.f32 %v496_v6, %v252_v8  ;;  %v577_v1 = vld [vmem:[%s1478_s7 + $0xb0] sm:$0xff]  ;;  %v608_v5 = vld [vmem:[%s1478_s7 + $0x1a8] sm:$0xff]  ;;  %v562_v8 = vld [vmem:[%s1478_s7 + $0x38] sm:$0xff] }
 0x28f   :  { %v458_v11 = vadd.f32 %v457_v9, %v248_v3  ;;  %v459_v13 = vpop.f32.mrb[6].mxu0  ;;  %v500_v14 = vpop.f32.mrb[6].mxu1  ;;  %v499_v18 = vadd.f32 %v498_v10, %v256_v12  ;;  %v607_v3 = vld [vmem:[%s1478_s7 + $0x1a0] sm:$0xff]  ;;  %v932_v4 = vpack.c.bf16 %v578_v2, %v577_v1  ;;  %v617_v1 = vld [vmem:[%s1478_s7 + $0x1f0] sm:$0xff]  ;;  %v618_v2 = vld [vmem:[%s1478_s7 + $0x1f8] sm:$0xff] }
 0x290   :  { %v460_v15 = vpop.f32.mrb[7].mxu0  ;;  %v501_v16 = vpop.f32.mrb[7].mxu1  ;;  %503 = vmax.xlane.f32.xlu1 %v456_v7  ;;  %v960_v6 = vpack.c.bf16 %v608_v5, %v607_v3  ;;  %v591_v9 = vld [vmem:[%s1478_s7 + $0x120] sm:$0xff]  ;;  %v580_v14 = vld [vmem:[%s1478_s7 + $0xc8] sm:$0xff]  ;;  %v980_v3 = vpack.c.bf16 %v618_v2, %v617_v1  ;;  %v602_v5 = vld [vmem:[%s1478_s7 + $0x178] sm:$0xff] }
 0x291   :  { %515 = vmax.xlane.f32.xlu0 %v458_v11  ;;  %933 = vmatprep.subr.bf16.mxu0 %v932_v4  ;;  %v579_v13 = vld [vmem:[%s1478_s7 + $0xc0] sm:$0xff]  ;;  %v609_v15 = vld [vmem:[%s1478_s7 + $0x1b0] sm:$0xff] }
 0x292   :  { %961 = vmatprep.subr.bf16.mxu1 %v960_v6  ;;  %v936_v16 = vpack.c.bf16 %v580_v14, %v579_v13  ;;  %v601_v4 = vld [vmem:[%s1478_s7 + $0x170] sm:$0xff] }
 0x293   :  { %v982_v6 = vpack.c.bf16 %v602_v5, %v601_v4 }
 0x294   :  { %527 = vmax.xlane.f32.xlu1 %v497_v17 }
 0x295   :  { %539 = vmax.xlane.f32.xlu0 %v499_v18 }
 0x31d   :  { %v504_v43 = vpop.xlane.xlu1 %503 }
 0x31e   :  { %v505_v44 = vsub.f32 %v456_v7, %v504_v43  ;;  %v516_v45 = vpop.xlane.xlu0 %515  ;;  %v561_v7 = vld [vmem:[%s1478_s7 + $0x30] sm:$0xff]  ;;  %v568_v43 = vld [vmem:[%s1478_s7 + $0x68] sm:$0xff] }
 0x31f   :  { %v517_v46 = vsub.f32 %v458_v11, %v516_v45  ;;  %v934_v10 = vpack.c.bf16 %v562_v8, %v561_v7  ;;  %v592_v11 = vld [vmem:[%s1478_s7 + $0x128] sm:$0xff]  ;;  %v946_v45 = vpack.c.bf16 %v568_v43, %v567_v42 }
 0x320   :  { %v506_v49 = vmul.f32 1.442695, %v505_v44  ;;  %v962_v12 = vpack.c.bf16 %v592_v11, %v591_v9  ;;  %v972_v44 = vpack.c.bf16 %v614_v41, %v613_v39 }
 0x321   :  { %v518_v47 = vmul.f32 1.442695, %v517_v46  ;;  %v528_v48 = vpop.xlane.xlu1 %527  ;;  %935 = vmatpush3.bf16.msra.mxu0 %v934_v10  ;;  %v597_v46 = vld [vmem:[%s1478_s7 + $0x150] sm:$0xff] }
 0x322   :  { %v540_v50 = vpop.xlane.xlu0 %539  ;;  %v529_v51 = vsub.f32 %v497_v17, %v528_v48  ;;  %963 = vmatpush3.bf16.msra.mxu1 %v962_v12  ;;  %v610_v17 = vld [vmem:[%s1478_s7 + $0x1b8] sm:$0xff]  ;;  %937 = vmatprep.subr.bf16.mxu0 %v936_v16 }
 0x323   :  { %1044 = vpow2.f32 %v518_v47  ;;  %v541_v52 = vsub.f32 %v499_v18, %v540_v50  ;;  %v563_v18 = vld [vmem:[%s1478_s7 + $0x40] sm:$0xff]  ;;  %v964_v20 = vpack.c.bf16 %v610_v17, %v609_v15  ;;  %v598_v47 = vld [vmem:[%s1478_s7 + $0x158] sm:$0xff] }
 0x324   :  { %1046 = vpow2.f32 %v506_v49  ;;  %v530_v54 = vmul.f32 1.442695, %v529_v51  ;;  %v938_v21 = vpack.c.bf16 %v564_v19, %v563_v18  ;;  %v974_v48 = vpack.c.bf16 %v598_v47, %v597_v46  ;;  %v585_v49 = vld [vmem:[%s1478_s7 + $0xf0] sm:$0xff]  ;;  %v586_v50 = vld [vmem:[%s1478_s7 + $0xf8] sm:$0xff]  ;;  %v615_v51 = vld [vmem:[%s1478_s7 + $0x1e0] sm:$0xff] }
 0x325   :  { %v542_v53 = vmul.f32 1.442695, %v541_v52  ;;  %965 = vmatprep.subr.bf16.mxu1 %v964_v20  ;;  %v948_v52 = vpack.c.bf16 %v586_v50, %v585_v49 }
 0x326   :  { %939 = vmatpush3.bf16.msra.mxu0 %v938_v21  ;;  %967 = vmatpush3.bf16.msra.mxu1 %v966_v24 }
 0x327   :  { %1048 = vpow2.f32 %v542_v53  ;;  %941 = vmatprep.subr.bf16.mxu0 %v940_v28  ;;  %969 = vmatprep.subr.bf16.mxu1 %v968_v32  ;;  %v616_v53 = vld [vmem:[%s1478_s7 + $0x1e8] sm:$0xff] }
 0x328   :  { %1050 = vpow2.f32 %v530_v54  ;;  %v569_v54 = vld [vmem:[%s1478_s7 + $0x70] sm:$0xff]  ;;  %v976_v60 = vpack.c.bf16 %v616_v53, %v615_v51 }
 0x329   :  { %v950_v61 = vpack.c.bf16 %v570_v59, %v569_v54 }
 0x32a   :  { %943 = vmatpush3.bf16.msra.mxu0 %v942_v33  ;;  %971 = vmatpush3.bf16.msra.mxu1 %v970_v36 }
 0x32b   :  { %945 = vmatprep.subr.bf16.mxu0 %v944_v40  ;;  %973 = vmatprep.subr.bf16.mxu1 %v972_v44 }
 0x32d   :  { %v1296_v55 = vpop.eup %1044 }
 0x32e   :  { %520 = vadd.xlane.f32.xlu0 %v1296_v55  ;;  %v1299_v56 = vpop.eup %1046  ;;  %947 = vmatpush3.bf16.msra.mxu0 %v946_v45 }
 0x32f   :  { %975 = vmatpush3.bf16.msra.mxu1 %v974_v48  ;;  %949 = vmatprep.subr.bf16.mxu0 %v948_v52 }
 0x330   :  { %977 = vmatprep.subr.bf16.mxu1 %v976_v60 }
 0x331   :  { %v1301_v57 = vpop.eup %1048 }
 0x332   :  { %544 = vadd.xlane.f32.xlu1 %v1301_v57  ;;  %508 = vadd.xlane.f32.xlu0 %v1299_v56  ;;  %v1305_v58 = vpop.eup %1050 }
 0x333   :  { %951 = vmatpush3.bf16.msra.mxu0 %v950_v61  ;;  %979 = vmatpush3.bf16.msra.mxu1 %v978_v0 }
 0x334   :  { %981 = vmatprep.subr.bf16.mxu1 %v980_v3 }
 0x336   :  { %532 = vadd.xlane.f32.xlu1 %v1305_v58 }
 0x337   :  { %983 = vmatpush3.bf16.msra.mxu1 %v982_v6 }
 0x3bb   :  { %v521_v7 = vpop.xlane.xlu0 %520 }
 0x3bc   :  { %1052 = vrcp.f32 %v521_v7 }
 0x3bf   :  { %v509_v8 = vpop.xlane.xlu0 %508  ;;  %v545_v9 = vpop.xlane.xlu1 %544 }
 0x3c0   :  { %1054 = vrcp.f32 %v509_v8 }
 0x3c1   :  { %1056 = vrcp.f32 %v545_v9 }
 0x3c3   :  { %v533_v10 = vpop.xlane.xlu1 %532 }
 0x3c4   :  { %1058 = vrcp.f32 %v533_v10 }
 0x3c6   :  { %v1053_v11 = vpop.eup %1052 }
 0x3c7   :  { %v523_v12 = vmul.f32 %v1053_v11, %v521_v7 }
 0x3c9   :  { %v524_v13 = vsub.f32 2.0, %v523_v12 }
 0x3ca   :  { %v1055_v14 = vpop.eup %1054 }
 0x3cb   :  { %v1057_v15 = vpop.eup %1056  ;;  %v525_v16 = vmul.f32 %v1053_v11, %v524_v13  ;;  %v511_v17 = vmul.f32 %v1055_v14, %v509_v8 }
 0x3cc   :  { %v547_v18 = vmul.f32 %v1057_v15, %v545_v9 }
 0x3cd   :  { %v512_v19 = vsub.f32 2.0, %v511_v17  ;;  %v526_v20 = vmul.f32 %v1296_v55, %v525_v16 }
 0x3ce   :  { %v1059_v21 = vpop.eup %1058  ;;  %v548_v22 = vsub.f32 2.0, %v547_v18 }
 0x3cf   :  { %v513_v23 = vmul.f32 %v1055_v14, %v512_v19  ;;  %v535_v24 = vmul.f32 %v1059_v21, %v533_v10  ;;  %552 = vst [vmem:[%s1479_s9 + $0x8] sm:$0xff] %v526_v20  ;;  %683 = vmatprep.mubr.f32.mxu0 %v526_v20 }
 0x3d0   :  { %v549_v25 = vmul.f32 %v1057_v15, %v548_v22 }
 0x3d1   :  { %v514_v26 = vmul.f32 %v1299_v56, %v513_v23  ;;  %v536_v27 = vsub.f32 2.0, %v535_v24 }
 0x3d2   :  { %v550_v28 = vmul.f32 %v1301_v57, %v549_v25 }
 0x3d3   :  { %551 = vst [vmem:[%s1479_s9] sm:$0xff] %v514_v26  ;;  %v537_v55 = vmul.f32 %v1059_v21, %v536_v27  ;;  %684 = vmatmul.mubr.f32.vlgmr.msra.gmra.mrb[8].mxu0 %v514_v26 }
 0x3d4   :  { %554 = vst [vmem:[%s1479_s9 + $0x18] sm:$0xff] %v550_v28  ;;  %753 = vmatprep.mubr.f32.mxu1 %v550_v28 }
 0x3d5   :  { %v538_v29 = vmul.f32 %v1305_v58, %v537_v55 }
 0x3d7   :  { %553 = vst [vmem:[%s1479_s9 + $0x10] sm:$0xff] %v538_v29  ;;  %754 = vmatmul.mubr.f32.vlgmr.msra.gmra.mrb[8].mxu1 %v538_v29 }
 0x4a6   :  { %v856_v56 = vpop.f32.mrb[8].mxu0 }
 0x4a7   :  { %v857_v57 = vpop.f32.mrb[9].mxu0 }
 0x4a8   :  { %v858_v30 = vadd.f32 %v857_v57, %v856_v56 }
 0x4aa   :  { %v891_v31 = vpop.f32.mrb[8].mxu1 }
 0x4ab   :  { %v892_v32 = vpop.f32.mrb[9].mxu1 }
 0x4ac   :  { %v893_v33 = vadd.f32 %v892_v32, %v891_v31 }
 0x4ae   :  { %v756_v34 = vadd.f32 %v893_v33, %v858_v30 }
 0x4b0   :  { %760 = vst.msk [vmem:[%s1480_s8] sm:$0xff] %vm759_vm2, %v756_v34 }

</bundles_post_ra>
